<compile_context>
chip_gen: v6e
topology: v6e:2x2x1
jax: 0.10.0
libtpu: 0.0.40
codegen_flags: <defaults>
</compile_context>

<pallas_src>
import jax
import jax.numpy as jnp
from jax.experimental import pallas as pl
from jax.experimental.pallas import tpu as pltpu

_LANE = 128  # vreg lane width (last dim)


def _round_up(x, m):
    return ((x + m - 1) // m) * m


def _sublane(dtype):
    # Sub-32-bit dtypes pack 2/4 rows per sublane.
    return {4: 8, 2: 16, 1: 32}.get(jnp.dtype(dtype).itemsize, 8)


def _encdec_resident_kernel(x_ref, w1_ref, w2_ref, o_ref):
    # encode: h = x_tile @ w1   (MXU, f32 accumulation; h never leaves VMEM)
    h = jnp.dot(x_ref[...], w1_ref[...], preferred_element_type=jnp.float32)
    if w2_ref.dtype != jnp.float32:          # bf16 path: narrow MXU operands,
        h = h.astype(w2_ref.dtype)           # f32 accumulation kept below.
    # decode: y = h @ w2
    y = jnp.dot(h, w2_ref[...], preferred_element_type=jnp.float32)
    o_ref[...] = y.astype(o_ref.dtype)


def _encdec_ntiled_kernel(x_ref, w1_ref, w2_ref, o_ref, h_ref):
    # Weight-streaming fallback: grid = (batch tiles, w2 column tiles).
    # h is computed once per batch tile (j == 0) and reused for every column tile.
    @pl.when(pl.program_id(1) == 0)
    def _():
        h_ref[...] = jnp.dot(x_ref[...], w1_ref[...],
                             preferred_element_type=jnp.float32)

    h = h_ref[...]
    if w2_ref.dtype != jnp.float32:
        h = h.astype(w2_ref.dtype)
    y = jnp.dot(h, w2_ref[...], preferred_element_type=jnp.float32)
    o_ref[...] = y.astype(o_ref.dtype)


def encoder_decoder(x, w1, w2, *, tile_m=None, tile_n=None,
                    compute_dtype=None, vmem_budget_bytes=None):
    batch, num_in = x.shape
    num_out = w1.shape[1]
    assert w1.shape == (num_in, num_out)
    assert w2.shape == (num_out, num_in)

    out_dtype = x.dtype
    if compute_dtype is not None:
        x = x.astype(compute_dtype)
        w1 = w1.astype(compute_dtype)
        w2 = w2.astype(compute_dtype)
    cdt = x.dtype
    item = jnp.dtype(cdt).itemsize
    out_item = jnp.dtype(out_dtype).itemsize
    sub = _sublane(cdt)

    # ---- Generation-aware VMEM budget --------------------------------------
    try:
        phys_vmem = int(pltpu.get_tpu_info().vmem_capacity_bytes)
    except Exception:
        phys_vmem = 64 * 1024 * 1024           # conservative (v7x-sized)
    if phys_vmem <= 64 * 1024 * 1024:          # v7x: 64 MiB physical VMEM
        default_budget, limit_cap = 26 * 1024 * 1024, 40 * 1024 * 1024
    else:                                      # v5e / v6e: 128 MiB physical
        default_budget, limit_cap = 40 * 1024 * 1024, 64 * 1024 * 1024
    budget = default_budget if vmem_budget_bytes is None else vmem_budget_bytes

    # ---- MXU / lane alignment padding --------------------------------------
    # Hidden dim lives only in the weights and the on-chip h: always pad.
    num_out_p = _round_up(num_out, _LANE)
    # In/out feature dim: padding inflates x reads and out writes, so only pad
    # when the pad fraction is small (<25%).
    num_in_128 = _round_up(num_in, _LANE)
    pad_in_cheap = (num_in_128 - num_in) * 4 <= num_in_128

    def resident_footprint(nin_p):
        # 2x: Pallas double-buffers every input, including the "resident" weights.
        w_bytes = 2 * (nin_p * num_out_p + num_out_p * nin_p) * item
        row = (2 * nin_p * item          # x tile (double-buffered)
               + 2 * nin_p * out_item    # out tile (double-buffered)
               + 4 * num_out_p           # fused h intermediate (f32)
               + 4 * nin_p)              # pre-cast y (f32)
        return w_bytes, row

    num_in_p = num_in_128 if pad_in_cheap else num_in
    w_bytes, row_bytes = resident_footprint(num_in_p)
    use_n_tiling = (tile_n is not None) or (w_bytes + 2 * sub * row_bytes > budget)
    if use_n_tiling:
        num_in_p = num_in_128              # column tiles must be lane aligned

    # Zero-pad operands (zero rows/cols contribute nothing to the result).
    if num_in_p != num_in:
        x = jnp.pad(x, ((0, 0), (0, num_in_p - num_in)))
    if (num_in_p != num_in) or (num_out_p != num_out):
        w1 = jnp.pad(w1, ((0, num_in_p - num_in), (0, num_out_p - num_out)))
        w2 = jnp.pad(w2, ((0, num_out_p - num_out), (0, num_in_p - num_in)))

    cost = pl.CostEstimate(
        flops=2 * batch * num_in_p * num_out_p + 2 * batch * num_out_p * num_in_p,
        transcendentals=0,
        bytes_accessed=(batch * num_in_p * item
                        + num_in_p * num_out_p * item
                        + num_out_p * num_in_p * item
                        + batch * num_in_p * out_item),
    )

    if not use_n_tiling:
        # ------------------ resident-weight path (1-D grid over batch) -------
        if tile_m is None:
            avail = max(budget - w_bytes, row_bytes * sub)
            max_rows = max((avail // row_bytes) // sub * sub, sub)
            tile_m = min(_round_up(batch, sub), 1024, max_rows)
            # Prefer >=2 (and even) grid steps so both v7x TensorCores get work.
            if batch >= 2 * sub:
                g = pl.cdiv(batch, tile_m)
                if g == 1:
                    tile_m = _round_up(pl.cdiv(batch, 2), sub)
                elif g % 2 == 1:
                    alt = _round_up(pl.cdiv(batch, g + 1), sub)
                    if alt >= sub and pl.cdiv(batch, alt) % 2 == 0:
                        tile_m = alt
        if tile_m > batch:
            tile_m = batch
        assert tile_m % sub == 0 or tile_m == batch
        grid_m = pl.cdiv(batch, tile_m)

        need = w_bytes + tile_m * row_bytes
        vmem_limit = int(min(max(need + (4 << 20), 32 << 20), limit_cap))

        out = pl.pallas_call(
            _encdec_resident_kernel,
            out_shape=jax.ShapeDtypeStruct((batch, num_in_p), out_dtype),
            grid=(grid_m,),
            in_specs=[
                # x: one batch tile per grid step (auto double-buffered DMA).
                pl.BlockSpec((tile_m, num_in_p), lambda i: (i, 0)),
                # w1, w2: same block every step -> VMEM-resident, no re-fetch.
                pl.BlockSpec((num_in_p, num_out_p), lambda i: (0, 0)),
                pl.BlockSpec((num_out_p, num_in_p), lambda i: (0, 0)),
            ],
            out_specs=pl.BlockSpec((tile_m, num_in_p), lambda i: (i, 0)),
            compiler_params=pltpu.CompilerParams(
                dimension_semantics=("parallel",),
                vmem_limit_bytes=vmem_limit),
            cost_estimate=cost,
        )(x, w1, w2)
    else:
        # ------------------ weight-streaming fallback (2-D grid) -------------
        if tile_n is None:
            tile_n = min(num_in_p, 4 * _LANE)
        assert tile_n % _LANE == 0 or tile_n == num_in_p
        grid_n = pl.cdiv(num_in_p, tile_n)

        w1_bytes = 2 * num_in_p * num_out_p * item       # resident (x2 buffers)
        w2_tile_bytes = 2 * num_out_p * tile_n * item    # streamed (x2 buffers)
        row = (2 * num_in_p * item + 2 * tile_n * out_item
               + 4 * num_out_p + 4 * tile_n)
        if tile_m is None:
            avail = budget - w1_bytes - w2_tile_bytes
            # TODO(synk): if w1 alone exceeds the budget, a K-streamed variant
            # with an f32 accumulator scratch would be needed; clamp tile here.
            max_rows = max((avail // row) // sub * sub, sub) if avail > 0 else sub
            tile_m = min(_round_up(batch, sub), 512, max_rows)
        if tile_m > batch:
            tile_m = batch
        assert tile_m % sub == 0 or tile_m == batch
        grid_m = pl.cdiv(batch, tile_m)

        need = w1_bytes + w2_tile_bytes + tile_m * row
        vmem_limit = int(min(max(need + (4 << 20), 32 << 20), limit_cap))

        out = pl.pallas_call(
            _encdec_ntiled_kernel,
            out_shape=jax.ShapeDtypeStruct((batch, num_in_p), out_dtype),
            grid=(grid_m, grid_n),
            in_specs=[
                pl.BlockSpec((tile_m, num_in_p), lambda i, j: (i, 0)),
                pl.BlockSpec((num_in_p, num_out_p), lambda i, j: (0, 0)),
                pl.BlockSpec((num_out_p, tile_n), lambda i, j: (0, j)),
            ],
            out_specs=pl.BlockSpec((tile_m, tile_n), lambda i, j: (i, j)),
            scratch_shapes=[pltpu.VMEM((tile_m, num_out_p), jnp.float32)],
            compiler_params=pltpu.CompilerParams(
                dimension_semantics=("parallel", "arbitrary"),
                vmem_limit_bytes=vmem_limit),
            cost_estimate=cost,
        )(x, w1, w2)

    return out[:, :num_in] if num_in_p != num_in else out


if __name__ == "__main__":
    key = jax.random.PRNGKey(0)
    kx, k1, k2, kx2, k3, k4 = jax.random.split(key, 6)

    # --- Case 1: module-sized shapes, resident-weight path -------------------
    batch, num_in, num_out = 16, 32, 16
    x = jax.random.normal(kx, (batch, num_in), dtype=jnp.float32)
    w1 = jax.random.uniform(k1, (num_in, num_out), dtype=jnp.float32,
                            minval=-0.1, maxval=0.1)
    w2 = jax.random.uniform(k2, (num_out, num_in), dtype=jnp.float32,
                            minval=-0.1, maxval=0.1)
    out = encoder_decoder(x, w1, w2)
    jax.block_until_ready(out)
    ref = jnp.dot(jnp.dot(x, w1, precision="highest"), w2, precision="highest")
    assert out.shape == (batch, num_in)
    assert jnp.allclose(out, ref, atol=1e-4, rtol=1e-2), "case1 mismatch"

    # --- Case 2: exercise the weight-streaming (N-tiled) fallback path -------
    b2, ni2, no2 = 32, 256, 128
    x2 = jax.random.normal(kx2, (b2, ni2), dtype=jnp.float32)
    w1b = jax.random.uniform(k3, (ni2, no2), dtype=jnp.float32,
                             minval=-0.1, maxval=0.1)
    w2b = jax.random.uniform(k4, (no2, ni2), dtype=jnp.float32,
                             minval=-0.1, maxval=0.1)
    out2 = encoder_decoder(x2, w1b, w2b, tile_m=16, tile_n=128)
    jax.block_until_ready(out2)
    ref2 = jnp.dot(jnp.dot(x2, w1b, precision="highest"), w2b,
                   precision="highest")
    assert out2.shape == (b2, ni2)
    assert jnp.allclose(out2, ref2, atol=1e-3, rtol=2e-2), "case2 mismatch"

    print("KERNEL_OK")
</pallas_src>

<mosaic_0001>
module attributes {stable_mosaic.version = 11 : i64} {
  func.func @_encdec_resident_kernel(%arg0: i32, %arg1: memref<8x32xf32, #tpu.memory_space<vmem>>, %arg2: memref<32x128xf32, #tpu.memory_space<vmem>>, %arg3: memref<128x32xf32, #tpu.memory_space<vmem>>, %arg4: memref<8x32xf32, #tpu.memory_space<vmem>>) attributes {dimension_semantics = [#tpu.dimension_semantics<parallel>], iteration_bounds = array<i64: 2>, scalar_prefetch = 0 : i64, scratch_operands = 0 : i64, tpu.core_type = #tpu.core_type<tc>, window_params = [{transform_indices = @transform_0, window_bounds = array<i64: 8, 32>}, {pipeline_mode = #tpu.pipeline_mode<synchronous>, transform_indices = @transform_1, window_bounds = array<i64: 32, 128>}, {pipeline_mode = #tpu.pipeline_mode<synchronous>, transform_indices = @transform_2, window_bounds = array<i64: 128, 32>}, {transform_indices = @transform_3, window_bounds = array<i64: 8, 32>}]} {
    %c0 = arith.constant 0 : index
    %c0_0 = arith.constant 0 : index
    %0 = vector.load %arg1[%c0, %c0_0] : memref<8x32xf32, #tpu.memory_space<vmem>>, vector<8x32xf32>
    %c0_1 = arith.constant 0 : index
    %c0_2 = arith.constant 0 : index
    %1 = vector.load %arg2[%c0_1, %c0_2] : memref<32x128xf32, #tpu.memory_space<vmem>>, vector<32x128xf32>
    %cst = arith.constant dense<0.000000e+00> : vector<8x128xf32>
    %2 = tpu.matmul %0, %1, %cst {dimension_numbers = #tpu.dot_dimension_numbers<[1], [0], [0], [1], [0, 0, 1, 1], [], []>} : vector<8x32xf32>, vector<32x128xf32>, vector<8x128xf32> -> vector<8x128xf32>
    %c0_3 = arith.constant 0 : index
    %c0_4 = arith.constant 0 : index
    %3 = vector.load %arg3[%c0_3, %c0_4] : memref<128x32xf32, #tpu.memory_space<vmem>>, vector<128x32xf32>
    %cst_5 = arith.constant dense<0.000000e+00> : vector<8x32xf32>
    %4 = tpu.matmul %2, %3, %cst_5 {dimension_numbers = #tpu.dot_dimension_numbers<[1], [0], [0], [1], [0, 0, 1, 1], [], []>} : vector<8x128xf32>, vector<128x32xf32>, vector<8x32xf32> -> vector<8x32xf32>
    %c0_6 = arith.constant 0 : index
    %c0_7 = arith.constant 0 : index
    %5 = vector.load %arg4[%c0_6, %c0_7] : memref<8x32xf32, #tpu.memory_space<vmem>>, vector<8x32xf32>
    tpu.vector_store %arg4[%c0_6, %c0_7], %4 {strides = array<i32>} : memref<8x32xf32, #tpu.memory_space<vmem>>, vector<8x32xf32>,
    return
  }
  func.func @transform_0(%arg0: i32) -> (i32, i32) {
    %c0_i32 = arith.constant 0 : i32
    %c0_i32_0 = arith.constant 0 : i32
    return %arg0, %c0_i32 : i32, i32
  }
  func.func @transform_1(%arg0: i32) -> (i32, i32) {
    %c0_i32 = arith.constant 0 : i32
    %c0_i32_0 = arith.constant 0 : i32
    %c0_i32_1 = arith.constant 0 : i32
    return %c0_i32, %c0_i32_0 : i32, i32
  }
  func.func @transform_2(%arg0: i32) -> (i32, i32) {
    %c0_i32 = arith.constant 0 : i32
    %c0_i32_0 = arith.constant 0 : i32
    %c0_i32_1 = arith.constant 0 : i32
    return %c0_i32, %c0_i32_0 : i32, i32
  }
  func.func @transform_3(%arg0: i32) -> (i32, i32) {
    %c0_i32 = arith.constant 0 : i32
    %c0_i32_0 = arith.constant 0 : i32
    return %arg0, %c0_i32 : i32, i32
  }
}

</mosaic_0001>

<bundles_post_ra>
// kernel: tpu_custom_call.1
= control target key start
LH: loop header
LB: loop body
LE: loop exit
PB: predicated region body
PF: predicated region fallthrough
CT: control target
= control target key end

     0   :  { %8 = vsyncpa [#allocation3], 0  ;;  %s795_s0 = inlined_call_operand.vmem [shape: f32[16,32], index: 0, kind: input, shape index: {}]   ;;  %s796_s1 = inlined_call_operand.vmem [shape: f32[32,128], index: 1, kind: input, shape index: {}]   ;;  %s797_s2 = inlined_call_operand.vmem [shape: f32[128,32], index: 2, kind: input, shape index: {}]   ;;  %s798_s3 = inlined_call_operand.hbm [shape: f32[16,32], index: 3, kind: output, shape index: {}]  }
   0x1   :  { %10 = vsyncpa [#allocation3 + $0x1], 0  ;;  %s610_s12 = smov 0   ;;  %s612_s13 = smov 0  }
   0x2   :  { %s614_s14 = smov 0   ;;  %s616_s15 = smov 0  }
   0x3 LB: > { %s631_s16 = sadd.s32 4294967295, %s585_s15   ;;  %s405_s17 = sadd.s32 4294967294, %s585_s15   ;;  %s585_s15 = sphi %s616_s15, %s804_s15   ;;  %s581_s14 = sphi %s614_s14, %s803_s14   ;;  %s577_s13 = sphi %s612_s13, %s802_s13   ;;  %s573_s12 = sphi %s610_s12, %s801_s12  }
   0x4   : > { %s635_s18 = sadd.s32 1, %s585_s15   ;;  %s91_s19 = sadd.s32 1, %s581_s14 }
   0x5   : > { %s88_s20 = ssub.s32 %s585_s15, %s635_s18  ;;  %p101_p0 = scmp.ne.s32.totalorder %s581_s14, %s577_s13 }
   0x6   : > { %p89_p1 = scmp.eq.s32.totalorder %s88_s20, 0  ;;  %p102_p2 = scmp.eq.s32.totalorder %s631_s16, 1 }
   0x7   : > { %p107_p3 = scmp.ne.s32.totalorder %s577_s13, %s573_s12  ;;  %p108_p4 = scmp.eq.s32.totalorder %s405_s17, 1 }
   0x8   : > { %s646_s21 = scalar_select %p89_p1, %s581_s14, %s91_s19  }
   0x9   : > { %p648_p5 = por %p102_p2, %p101_p0  ;;  %p652_p6 = por %p108_p4, %p107_p3 }
   0xa   : > { %p408_p7 = scmp.ge.s32.totalorder %s585_s15, 1  ;;  %p139_p8 = scmp.lt.s32.totalorder %s585_s15, 3 }
   0xc   : > { %p140_p9 = pnand %p408_p7, %p139_p8 }
   0xd   : > { %p162_p10 = scmp.lt.s32.totalorder (!%p140_p9), %s631_s16, 1  ;;  %s159_s6 = sand.u32 (!%p140_p9), 1, %s577_s13  }
   0xe   : > { %143 = sbr.rel (%p140_p9) target bundleno = 428 (0x1ac), region = 32  ;;  %s409_s7 = sshll.u32 (!%p140_p9), %s159_s6, 3 }
   0xf   : > { %s161_s9 = scalar_lea.vmem (!%p140_p9), [#allocation2], %s409_s7  ;;  %s333_s20 = scalar_lea.sflag (!%p140_p9), [#allocation3], %s159_s6 }
  0x10   : > { %s346_s10 = sshll.u32 (!%p140_p9), %s161_s9, 4  ;;  %s755_s10 = int_to_ptr.vmem [resolvable:$true] %s346_s10 }
  0x13   : > { %v170_v0 = vld [vmem:[%s796_s1 + $0x18] sm:$0xff]  ;;  %v587_v1 = vmov 0.0   ;;  %v169_v2 = vld [vmem:[%s796_s1 + $0x10] sm:$0xff]  ;;  %vm588_vm0 = vmmov 0   ;;  %s163_s30 = scalar_select %p162_p10, %s631_s16, 1  ;;  %v168_v5 = vld [vmem:[%s796_s1 + $0x8] sm:$0xff] }
  0x14   : > { %438 = vmatprep.subr.mxu0 %v587_v1  ;;  %446 = vmatprep.mubr.msk.f32.mxu0 %vm588_vm0, %v587_v1  ;;  %v260_v3 = vld [vmem:[%s797_s2 + $0x78] sm:$0xff]  ;;  %v259_v4 = vld [vmem:[%s797_s2 + $0x70] sm:$0xff]  ;;  %v258_v6 = vld [vmem:[%s797_s2 + $0x68] sm:$0xff]  ;;  %vm171_vm1 = vcmask 261120  }
  0x15   : > { %439 = vmatpush3.msra.mxu0 %v170_v0  ;;  %449 = vmatprep.subr.mxu1 %v587_v1  ;;  %s410_s8 = sshll.u32 %s163_s30, 3  ;;  %v167_v7 = vld [vmem:[%s796_s1] sm:$0xff]  ;;  %v256_v10 = vld [vmem:[%s797_s2 + $0x58] sm:$0xff]  ;;  %v255_v11 = vld [vmem:[%s797_s2 + $0x50] sm:$0xff] }
  0x16   : > { %440 = vmatprep.subr.mxu0 %v587_v1  ;;  %450 = vmatpush3.msra.mxu1 %v260_v3  ;;  %s165_s24 = scalar_lea.vmem %s795_s0, %s410_s8  ;;  %v257_v9 = vld [vmem:[%s797_s2 + $0x60] sm:$0xff]  ;;  %v254_v12 = vld [vmem:[%s797_s2 + $0x48] sm:$0xff]  ;;  %v252_v14 = vld [vmem:[%s797_s2 + $0x38] sm:$0xff]  ;;  %s413_s8 = sshll.u32 %s631_s16, 7 }
  0x17   : > { %441 = vmatpush3.msra.mxu0 %v169_v2  ;;  %451 = vmatprep.subr.mxu1 %v587_v1  ;;  %v166_v8 = vld [vmem:[%s165_s24] sm:$0xff]  ;;  %v251_v15 = vld [vmem:[%s797_s2 + $0x30] sm:$0xff]  ;;  %v250_v16 = vld [vmem:[%s797_s2 + $0x28] sm:$0xff]  ;;  %s753_s19 = scalar_lea.hbm %s798_s3, %s413_s8  ;;  %s525_s24 = scalar_lea.vmem %s755_s10, 128 }
  0x18   : > { %442 = vmatprep.subr.mxu0 %v587_v1  ;;  %452 = vmatpush3.msra.mxu1 %v259_v4  ;;  %v253_v13 = vld [vmem:[%s797_s2 + $0x40] sm:$0xff]  ;;  %v248_v18 = vld [vmem:[%s797_s2 + $0x18] sm:$0xff]  ;;  %v247_v19 = vld [vmem:[%s797_s2 + $0x10] sm:$0xff]  ;;  %p526_p11 = scmp.ne.s32.totalorder %s755_s10, %s525_s24  ;;  %s589_s16 = smov [#allocation2]  }
  0x19   : > { %443 = vmatpush3.msra.mxu0 %v168_v5  ;;  %453 = vmatprep.subr.mxu1 %v587_v1  ;;  %v249_v17 = vld [vmem:[%s797_s2 + $0x20] sm:$0xff]  ;;  %v246_v20 = vld [vmem:[%s797_s2 + $0x8] sm:$0xff]  ;;  %s529_s25 = sshll.u32 %s589_s16, 4  ;;  %s530_s25 = int_to_ptr.vmem [resolvable:$false] %s529_s25 }
  0x1a   : > { %444 = vmatprep.subr.mxu0 %v587_v1  ;;  %454 = vmatpush3.msra.mxu1 %v258_v6  ;;  %v245_v21 = vld [vmem:[%s797_s2] sm:$0xff]  ;;  %p527_p12 = pnand %p526_p11, %p648_p5  ;;  %s531_s26 = scalar_lea.vmem %s530_s25, 256 }
  0x1b   : > { %445 = vmatpush3.msra.mxu0 %v167_v7  ;;  %455 = vmatprep.subr.mxu1 %v587_v1  ;;  %p532_p0 = scmp.lt.s32.totalorder %s755_s10, %s530_s25  ;;  %p533_p1 = scmp.lt.s32.totalorder %s531_s26, %s525_s24 }
  0x1c   : > { %447 = vmatmul.mubr.msk.f32.vlgmr.msra.gmra.mxu0 %vm171_vm1, %v166_v8  ;;  %456 = vmatpush3.msra.mxu1 %v257_v9  ;;  %p528_p13 = pneg %p527_p12 }
  0x1d   : > { %457 = vmatprep.subr.mxu1 %v587_v1  ;;  %481 = vmatprep.mubr.msk.f32.mxu1 %vm588_vm0, %v587_v1  ;;  %p534_p2 = por %p533_p1, %p532_p0 }
  0x1e   : > { %458 = vmatpush3.msra.mxu1 %v256_v10 }
  0x1f   : > { %459 = vmatprep.subr.mxu1 %v587_v1  ;;  %p535_p3 = pnand %p534_p2, %p528_p13 }
  0x20   : > { %460 = vmatpush3.msra.mxu1 %v255_v11 }
  0x21   : > { %461 = vmatprep.subr.mxu1 %v587_v1 }
  0x22   : > { %462 = vmatpush3.msra.mxu1 %v254_v12 }
  0x23   : > { %463 = vmatprep.subr.mxu1 %v587_v1 }
  0x24   : > { %464 = vmatpush3.msra.mxu1 %v253_v13 }
  0x25   : > { %465 = vmatprep.subr.mxu1 %v587_v1 }
  0x26   : > { %466 = vmatpush3.msra.mxu1 %v252_v14 }
  0x27   : > { %467 = vmatprep.subr.mxu1 %v587_v1 }
  0x28   : > { %468 = vmatpush3.msra.mxu1 %v251_v15 }
  0x29   : > { %469 = vmatprep.subr.mxu1 %v587_v1 }
  0x2a   : > { %470 = vmatpush3.msra.mxu1 %v250_v16 }
  0x2b   : > { %471 = vmatprep.subr.mxu1 %v587_v1 }
  0x2c   : > { %472 = vmatpush3.msra.mxu1 %v249_v17 }
  0x2d   : > { %473 = vmatprep.subr.mxu1 %v587_v1 }
  0x2e   : > { %474 = vmatpush3.msra.mxu1 %v248_v18 }
  0x2f   : > { %475 = vmatprep.subr.mxu1 %v587_v1 }
  0x30   : > { %476 = vmatpush3.msra.mxu1 %v247_v19 }
  0x31   : > { %477 = vmatprep.subr.mxu1 %v587_v1 }
  0x32   : > { %478 = vmatpush3.msra.mxu1 %v246_v20 }
  0x33   : > { %479 = vmatprep.subr.mxu1 %v587_v1 }
  0x34   : > { %480 = vmatpush3.msra.mxu1 %v245_v21 }
  0xdc   : > { %v241_v22 = vpop.f32.mrf.mxu0 }
  0xdd   : > { %482 = vmatmul.mubr.f32.vlgmr.msra.gmra.mxu1 %v241_v22 }
  0xde   : > { %v448_v23 = vpop.f32.mrf.mxu0 }
 0x19d   : > { %v327_v24 = vpop.f32.mrf.mxu1 }
 0x19e   : > { %331 = vst.msk [vmem:[%s161_s9] sm:$0xff] %vm171_vm1, %v327_v24 }
 0x19f   : > { %v483_v25 = vpop.f32.mrf.mxu1 }
 0x1a0   : > { %538 = shalt.err (!%p535_p3)
}
 0x1a1   : > { %s539_s27 = scalar_lea.hbm %s753_s19, 128  ;;  %s543_s30 = scalar_lea.hbm %s798_s3, 256 }
 0x1a2   : > { %p540_p4 = scmp.ne.s32.totalorder %s753_s19, %s539_s27  ;;  %p544_p9 = scmp.lt.s32.totalorder %s753_s19, %s798_s3 }
 0x1a3   : > { %p545_p10 = scmp.lt.s32.totalorder %s543_s30, %s539_s27 }
 0x1a4   : > { %p541_p7 = pnand %p540_p4, %p648_p5 }
 0x1a5   : > { %p546_p11 = por %p545_p10, %p544_p9 }
 0x1a6   : > { %p542_p8 = pneg %p541_p7 }
 0x1a8   : > { %p547_p12 = pnand %p546_p11, %p542_p8 }
 0x1aa   : > { %550 = shalt.err (!%p547_p12)
}
 0x1ab   : > { %484 = dma.vmem_to_hbm [thread:$0]  (%p648_p5), %s755_s10, 128, %s753_s19, %s333_s20  }
 0x1ac PF: > { %p490_p13 = scmp.ge.s32.totalorder %s585_s15, 2  ;;  %s358_s6 = sand.u32 1, %s573_s12  }
 0x1ad   : > { %s359_s7 = scalar_lea.sflag [#allocation3], %s358_s6 }
 0x1ae   : > { %p487_p0 = pnand %p490_p13, %p652_p6 }
 0x1b0   : > { %p488_p1 = pneg %p487_p0 }
 0x1b2   : > { %568 = dma.done.wait (%p488_p1), %s359_s7, 128  }
 0x1b3   : > { %570 = vsyncadd (%p488_p1), %s359_s7, 4294967168  ;;  %p13_p2 = scmp.ge.s32.totalorder %s635_s18, 4   ;;  %s801_s12 = smov %s577_s13 }
 0x1b4   : > { %s802_s13 = smov %s581_s14  ;;  %s803_s14 = smov %s646_s21 }
 0x1b5   : > { %s804_s15 = smov %s635_s18  ;;  %15 = sbr.rel (!%p13_p2) target bundleno = 3 (0x3), region = 67 }
 0x1ba   :  { %364 = vsyncpa [#allocation3], 1 }
 0x1bb   :  { %366 = vsyncpa [#allocation3 + $0x1], 1 }

</bundles_post_ra>
